<compile_context>
chip_gen: v6e
topology: v6e:2x2x1
jax: 0.10.0
libtpu: 0.0.40
codegen_flags: <defaults>
</compile_context>

<pallas_src>
import jax
import jax.numpy as jnp
from jax.experimental import pallas as pl
from jax.experimental.pallas import tpu as pltpu

_LANE = 128
_SUBLANE = 8
_VMEM_BUDGET = 30 * 1024 * 1024     # target for resident weights + tile buffers
_WEIGHT_BUDGET = 20 * 1024 * 1024   # resident-weight target before feature split


def _round_up(x, m):
    return (x + m - 1) // m * m


def _pad2(a, rows, cols, dtype=None):
    """Zero-pad a (possibly smaller) 2-D array into a (rows, cols) buffer."""
    a = jnp.asarray(a)
    out = jnp.zeros((rows, cols), dtype if dtype is not None else a.dtype)
    return out.at[: a.shape[0], : a.shape[1]].set(a.astype(out.dtype))


# --------------------------------------------------------------------------- #
# Kernels.  Grid = (batch tiles, output-feature tiles); feature axis is inner
# ("arbitrary") so the fc_0 activation scratch computed at j == 0 is reused.
# --------------------------------------------------------------------------- #
def _resblock_kernel_shortcut(x_ref, w0_ref, b0_ref, wcat_ref, b1_ref,
                              o_ref, neta_ref):
    j = pl.program_id(1)

    @pl.when(j == 0)
    def _():
        x = x_ref[...].astype(jnp.float32)
        h = jnp.maximum(x, 0.0)                                  # relu(x)
        net = jnp.dot(h.astype(w0_ref.dtype), w0_ref[...],
                      preferred_element_type=jnp.float32) + b0_ref[...]
        neta_ref[...] = jnp.maximum(net, 0.0).astype(neta_ref.dtype)

    # Fused shortcut + fc_1:  [x | relu(net)] @ [ws ; w1] + b1
    cat = jnp.concatenate(
        [x_ref[...].astype(wcat_ref.dtype), neta_ref[...].astype(wcat_ref.dtype)],
        axis=1)
    out = jnp.dot(cat, wcat_ref[...],
                  preferred_element_type=jnp.float32) + b1_ref[...]
    o_ref[...] = out.astype(o_ref.dtype)


def _resblock_kernel_identity(x_ref, w0_ref, b0_ref, w1_ref, b1_ref,
                              o_ref, neta_ref):
    j = pl.program_id(1)
    block_n = o_ref.shape[-1]

    @pl.when(j == 0)
    def _():
        x = x_ref[...].astype(jnp.float32)
        h = jnp.maximum(x, 0.0)
        net = jnp.dot(h.astype(w0_ref.dtype), w0_ref[...],
                      preferred_element_type=jnp.float32) + b0_ref[...]
        neta_ref[...] = jnp.maximum(net, 0.0).astype(neta_ref.dtype)

    dx = jnp.dot(neta_ref[...].astype(w1_ref.dtype), w1_ref[...],
                 preferred_element_type=jnp.float32) + b1_ref[...]
    col0 = pl.multiple_of(j * block_n, 128)
    x_s = x_ref[:, pl.ds(col0, block_n)].astype(jnp.float32)   # identity shortcut
    o_ref[...] = (x_s + dx).astype(o_ref.dtype)


# --------------------------------------------------------------------------- #
# Host-side parameter preparation (pad + cast once; cache and reuse).
# --------------------------------------------------------------------------- #
def prepare_params(params, *, use_bf16=True):
    w0 = jnp.asarray(params["w0"])
    b0 = jnp.asarray(params["b0"])
    w1 = jnp.asarray(params["w1"])
    b1 = jnp.asarray(params["b1"])
    size_in, size_h = w0.shape
    size_out = w1.shape[1]
    has_shortcut = "ws" in params

    in_p = _round_up(size_in, _LANE)
    h_p = _round_up(size_h, _LANE)
    out_p = _round_up(size_out, _LANE)
    w_dtype = jnp.bfloat16 if use_bf16 else jnp.float32

    prep = {
        "_prepared": True,
        "sizes": (size_in, size_h, size_out),
        "padded": (in_p, h_p, out_p),
        "has_shortcut": has_shortcut,
        "w_dtype": w_dtype,
        "w0": _pad2(w0, in_p, h_p, w_dtype),
        "b0": _pad2(b0.reshape(1, -1), 1, h_p, jnp.float32),
        "b1": _pad2(b1.reshape(1, -1), 1, out_p, jnp.float32),
    }
    if has_shortcut:
        ws_p = _pad2(jnp.asarray(params["ws"]), in_p, out_p, w_dtype)
        w1_p = _pad2(w1, h_p, out_p, w_dtype)
        prep["wcat"] = jnp.concatenate([ws_p, w1_p], axis=0)   # (in_p + h_p, out_p)
    else:
        prep["w1"] = _pad2(w1, h_p, out_p, w_dtype)
    return prep


# --------------------------------------------------------------------------- #
# Wrapper.
# --------------------------------------------------------------------------- #
def resnet_block_fc(x, params, *, block_m=512, block_n=None,
                    use_bf16=True, out_dtype=None):
    """ResnetBlockFC forward via a Pallas TPU kernel.

    x:      [N, size_in] float32 or bfloat16 (kept as-is; no wrapper-side cast).
    params: raw dict (w0/b0/w1/b1[, ws]) or the result of prepare_params()
            (pre-padded / pre-cast — cache it when calling repeatedly).
    """
    if not (isinstance(params, dict) and params.get("_prepared", False)):
        params = prepare_params(params, use_bf16=use_bf16)
    prep = params
    size_in, size_h, size_out = prep["sizes"]
    in_p, h_p, out_p = prep["padded"]
    has_shortcut = prep["has_shortcut"]
    w_dtype = prep["w_dtype"]
    w_item = jnp.dtype(w_dtype).itemsize

    n = x.shape[0]
    assert x.shape[1] == size_in, "x feature dim does not match params"
    out_dtype = x.dtype if out_dtype is None else out_dtype
    x_item = jnp.dtype(x.dtype).itemsize
    o_item = jnp.dtype(out_dtype).itemsize

    k_cat = (in_p + h_p) if has_shortcut else h_p          # K of 2nd matmul
    w0_bytes = in_p * h_p * w_item + _SUBLANE * h_p * 4    # w0 + b0 (resident)

    def _w2_bytes(bn, nbuf):
        return nbuf * (k_cat * bn * w_item + _SUBLANE * bn * 4)

    # ---- output-feature tile (block_n) -------------------------------------
    divisors = sorted((d for d in range(_LANE, out_p + 1, _LANE) if out_p % d == 0),
                      reverse=True)
    if block_n is not None:
        req = max(_LANE, min(int(block_n), out_p))
        bn = next((d for d in divisors if d <= req), divisors[-1])
    else:
        bn = next((d for d in divisors
                   if w0_bytes + _w2_bytes(d, 1 if d == out_p else 2) <= _WEIGHT_BUDGET),
                  divisors[-1])
    grid_n = out_p // bn
    nbuf2 = 1 if grid_n == 1 else 2
    # TODO(synk): if w0_bytes alone exceeds the VMEM budget (huge in/h dims),
    # additionally split K with an f32 accumulator ("arbitrary" innermost axis).

    # ---- batch tile (block_m), VMEM-budget and megacore aware ---------------
    resident = w0_bytes + _w2_bytes(bn, nbuf2)
    per_row = 2 * in_p * x_item + 2 * bn * o_item + h_p * w_item
    bm_cap = max(((_VMEM_BUDGET - resident) // per_row) // _SUBLANE * _SUBLANE,
                 _SUBLANE)
    n8 = _round_up(max(n, 1), _SUBLANE)
    bm = min(_round_up(max(block_m, _SUBLANE), _SUBLANE), bm_cap)
    if n8 <= bm:
        # Whole batch in one tile: split in two if large enough so both v7x
        # TensorCores get work on the "parallel" batch axis.
        bm = _round_up(-(-n8 // 2), _SUBLANE) if n8 >= 512 else n8
    n_p = _round_up(n8, bm)
    grid_m = n_p // bm

    # ---- explicit scoped-VMEM limit (buffers + temporaries + headroom) ------
    tiles = 2 * bm * in_p * x_item + 2 * bm * bn * o_item + bm * h_p * w_item
    temps = bm * (k_cat * w_item + h_p * 4 + bn * 4)
    need = resident + tiles + temps
    vmem_limit = int(min(max(need * 3 // 2 + (2 << 20), 32 << 20), 56 << 20))

    # ---- pad x only when needed (no wrapper-side activation dtype cast) -----
    if x.shape == (n_p, in_p):
        x_p = x
    else:
        x_p = jnp.zeros((n_p, in_p), x.dtype).at[:n, :size_in].set(x)

    # ---- specs ---------------------------------------------------------------
    def _spec(shape, index_map, single_buffer):
        if single_buffer:
            return pl.BlockSpec(shape, index_map, pipeline_mode=pl.Buffered(1))
        return pl.BlockSpec(shape, index_map)

    x_spec = pl.BlockSpec((bm, in_p), lambda i, j: (i, 0))
    o_spec = pl.BlockSpec((bm, bn), lambda i, j: (i, j))
    w0_spec = _spec((in_p, h_p), lambda i, j: (0, 0), True)
    b0_spec = _spec((1, h_p), lambda i, j: (0, 0), True)
    w2_spec = _spec((k_cat, bn), lambda i, j: (0, j), grid_n == 1)
    b1_spec = _spec((1, bn), lambda i, j: (0, j), grid_n == 1)

    kernel = _resblock_kernel_shortcut if has_shortcut else _resblock_kernel_identity
    w2 = prep["wcat"] if has_shortcut else prep["w1"]

    # Advisory cost estimate (weights counted once; w2 restreamed only if split).
    w2_reads = grid_m if grid_n > 1 else 1
    cost = pl.CostEstimate(
        flops=int(2 * n_p * (in_p * h_p + k_cat * out_p)),
        transcendentals=0,
        bytes_accessed=int(n_p * in_p * x_item + n_p * out_p * o_item
                           + in_p * h_p * w_item
                           + w2_reads * k_cat * out_p * w_item
                           + (h_p + out_p) * 4))

    out_padded = pl.pallas_call(
        kernel,
        out_shape=jax.ShapeDtypeStruct((n_p, out_p), out_dtype),
        grid_spec=pltpu.PrefetchScalarGridSpec(
            num_scalar_prefetch=0,
            grid=(grid_m, grid_n),
            in_specs=[x_spec, w0_spec, b0_spec, w2_spec, b1_spec],
            out_specs=o_spec,
            scratch_shapes=[pltpu.VMEM((bm, h_p), w_dtype)]),
        compiler_params=pltpu.CompilerParams(
            dimension_semantics=("parallel", "arbitrary"),
            vmem_limit_bytes=vmem_limit),
        cost_estimate=cost,
    )(x_p, prep["w0"], prep["b0"], w2, prep["b1"])

    return out_padded[:n, :size_out]


# --------------------------------------------------------------------------- #
# Parameter init mirroring ResnetBlockFC.__init__ (weights stored [in, out]).
# --------------------------------------------------------------------------- #
def init_params(key, size_in, size_out=None, size_h=None):
    if size_out is None:
        size_out = size_in
    if size_h is None:
        size_h = min(size_in, size_out)
    k0, k1, k2, k3 = jax.random.split(key, 4)
    bound0 = 1.0 / (size_in ** 0.5)
    bound1 = 1.0 / (size_h ** 0.5)
    params = {
        "w0": jax.random.uniform(k0, (size_in, size_h), jnp.float32, -bound0, bound0),
        "b0": jax.random.uniform(k1, (size_h,), jnp.float32, -bound0, bound0),
        "w1": jnp.zeros((size_h, size_out), jnp.float32),    # nn.init.zeros_
        "b1": jax.random.uniform(k2, (size_out,), jnp.float32, -bound1, bound1),
    }
    if size_in != size_out:
        params["ws"] = jax.random.uniform(
            k3, (size_in, size_out), jnp.float32, -bound0, bound0)
    return params


def resnet_block_fc_ref(x, params, dot_dtype=jnp.float32):
    """Pure-JAX reference; dot_dtype mirrors bf16 matmul operands."""
    h = jnp.maximum(x, 0.0)
    net = jnp.dot(h.astype(dot_dtype), params["w0"].astype(dot_dtype),
                  preferred_element_type=jnp.float32) + params["b0"]
    net_a = jnp.maximum(net, 0.0)
    dx = jnp.dot(net_a.astype(dot_dtype), params["w1"].astype(dot_dtype),
                 preferred_element_type=jnp.float32) + params["b1"]
    if "ws" in params:
        x_s = jnp.dot(x.astype(dot_dtype), params["ws"].astype(dot_dtype),
                      preferred_element_type=jnp.float32)
    else:
        x_s = x
    return x_s + dx


if __name__ == "__main__":
    key = jax.random.PRNGKey(0)
    kx1, kx2, kx3, kp1, kp2, kp3, kw1, kw2 = jax.random.split(key, 8)

    # Case 1: linear shortcut path (size_in != size_out), f32 matmuls (tight check).
    n1, s_in1, s_out1 = 20, 32, 48           # size_h = min(32, 48) = 32
    x1 = jax.random.normal(kx1, (n1, s_in1), jnp.float32)
    p1 = init_params(kp1, s_in1, s_out1)
    out1 = jax.block_until_ready(resnet_block_fc(x1, p1, use_bf16=False))
    ref1 = resnet_block_fc_ref(x1, p1)
    assert out1.shape == (n1, s_out1)
    assert jnp.allclose(out1, ref1, atol=1e-4, rtol=1e-4), "case1 mismatch"

    # Case 2: shortcut path, bf16, pre-prepared (cached) weights, multi-tile grid
    # (batch and output-feature split) exercising the fused W_cat kernel.
    n2, s_in2, s_out2 = 150, 40, 300
    x2 = jax.random.normal(kx2, (n2, s_in2), jnp.float32)
    p2 = init_params(kp2, s_in2, s_out2)
    p2["w1"] = jax.random.uniform(kw1, p2["w1"].shape, jnp.float32,
                                  -1.0 / (40 ** 0.5), 1.0 / (40 ** 0.5))
    prep2 = prepare_params(p2, use_bf16=True)          # pad/cast once, reuse
    out2a = jax.block_until_ready(resnet_block_fc(x2, prep2, block_m=64, block_n=128))
    out2b = jax.block_until_ready(resnet_block_fc(x2, p2, block_m=64, block_n=128,
                                                  use_bf16=True))
    ref2 = resnet_block_fc_ref(x2, p2, dot_dtype=jnp.bfloat16)
    assert out2a.shape == (n2, s_out2)
    assert jnp.allclose(out2a, ref2, atol=2e-3, rtol=2e-3), "case2 mismatch vs bf16 ref"
    assert jnp.allclose(out2a, out2b, atol=1e-6, rtol=1e-6), "prepared-vs-raw mismatch"
    assert jnp.allclose(out2a, resnet_block_fc_ref(x2, p2), atol=1e-1, rtol=1e-1)

    # Case 3: identity shortcut (size_in == size_out), untrained w1 == 0 -> exact.
    p3 = init_params(kp3, s_in1)
    out3 = jax.block_until_ready(resnet_block_fc(x1, p3))
    ref3 = resnet_block_fc_ref(x1, p3)
    assert out3.shape == (n1, s_in1)
    assert jnp.allclose(out3, ref3, atol=1e-5, rtol=1e-5), "case3 mismatch"

    # Case 4: identity shortcut with multi-tile grid (batch + output-feature split).
    n4, s4 = 272, 256
    x4 = jax.random.normal(kx3, (n4, s4), jnp.float32)
    p4 = init_params(jax.random.fold_in(kp3, 1), s4)
    p4["w1"] = jax.random.uniform(kw2, p4["w1"].shape, jnp.float32,
                                  -1.0 / (s4 ** 0.5), 1.0 / (s4 ** 0.5))
    out4 = jax.block_until_ready(resnet_block_fc(x4, p4, block_m=128, block_n=128))
    ref4 = resnet_block_fc_ref(x4, p4, dot_dtype=jnp.bfloat16)
    assert out4.shape == (n4, s4)
    assert jnp.allclose(out4, ref4, atol=2e-3, rtol=2e-3), "case4 mismatch"

    print("KERNEL_OK")
</pallas_src>

<mosaic_0001>
module attributes {stable_mosaic.version = 11 : i64} {
  func.func @_resblock_kernel_shortcut(%arg0: i32, %arg1: i32, %arg2: memref<24x128xf32, #tpu.memory_space<vmem>>, %arg3: memref<128x128xf32, #tpu.memory_space<vmem>>, %arg4: memref<1x128xf32, #tpu.memory_space<vmem>>, %arg5: memref<256x128xf32, #tpu.memory_space<vmem>>, %arg6: memref<1x128xf32, #tpu.memory_space<vmem>>, %arg7: memref<24x128xf32, #tpu.memory_space<vmem>>, %arg8: memref<24x128xf32, #tpu.memory_space<vmem>>) attributes {dimension_semantics = [#tpu.dimension_semantics<parallel>, #tpu.dimension_semantics<arbitrary>], iteration_bounds = array<i64: 1, 1>, scalar_prefetch = 0 : i64, scratch_operands = 1 : i64, tpu.core_type = #tpu.core_type<tc>, window_params = [{transform_indices = @transform_0, window_bounds = array<i64: 24, 128>}, {pipeline_mode = #tpu.pipeline_mode<synchronous>, transform_indices = @transform_1, window_bounds = array<i64: 128, 128>}, {pipeline_mode = #tpu.pipeline_mode<synchronous>, transform_indices = @transform_2, window_bounds = array<i64: 1, 128>}, {pipeline_mode = #tpu.pipeline_mode<synchronous>, transform_indices = @transform_3, window_bounds = array<i64: 256, 128>}, {pipeline_mode = #tpu.pipeline_mode<synchronous>, transform_indices = @transform_4, window_bounds = array<i64: 1, 128>}, {transform_indices = @transform_5, window_bounds = array<i64: 24, 128>}]} {
    %c0_i32 = arith.constant 0 : i32
    %0 = arith.cmpi eq, %arg1, %c0_i32 : i32
    %1 = arith.extui %0 : i1 to i32
    %c0_i32_0 = arith.constant 0 : i32
    %2 = arith.cmpi ne, %1, %c0_i32_0 : i32
    scf.if %2 {
      %c0_10 = arith.constant 0 : index
      %c0_11 = arith.constant 0 : index
      %12 = vector.load %arg2[%c0_10, %c0_11] : memref<24x128xf32, #tpu.memory_space<vmem>>, vector<24x128xf32>
      %cst_12 = arith.constant 0.000000e+00 : f32
      %13 = vector.broadcast %cst_12 : f32 to vector<24x128xf32>
      %14 = arith.maximumf %12, %13 : vector<24x128xf32>
      %c0_13 = arith.constant 0 : index
      %c0_14 = arith.constant 0 : index
      %15 = vector.load %arg3[%c0_13, %c0_14] : memref<128x128xf32, #tpu.memory_space<vmem>>, vector<128x128xf32>
      %cst_15 = arith.constant dense<0.000000e+00> : vector<24x128xf32>
      %16 = tpu.matmul %14, %15, %cst_15 {dimension_numbers = #tpu.dot_dimension_numbers<[1], [0], [0], [1], [0, 0, 1, 1], [], []>} : vector<24x128xf32>, vector<128x128xf32>, vector<24x128xf32> -> vector<24x128xf32>
      %c0_16 = arith.constant 0 : index
      %c0_17 = arith.constant 0 : index
      %17 = vector.load %arg4[%c0_16, %c0_17] : memref<1x128xf32, #tpu.memory_space<vmem>>, vector<1x128xf32>
      %18 = vector.broadcast %17 : vector<1x128xf32> to vector<24x128xf32>
      %19 = arith.addf %16, %18 : vector<24x128xf32>
      %cst_18 = arith.constant 0.000000e+00 : f32
      %20 = vector.broadcast %cst_18 : f32 to vector<24x128xf32>
      %21 = arith.maximumf %19, %20 : vector<24x128xf32>
      %c0_19 = arith.constant 0 : index
      %c0_20 = arith.constant 0 : index
      %22 = vector.load %arg8[%c0_19, %c0_20] : memref<24x128xf32, #tpu.memory_space<vmem>>, vector<24x128xf32>
      tpu.vector_store %arg8[%c0_19, %c0_20], %21 {strides = array<i32>} : memref<24x128xf32, #tpu.memory_space<vmem>>, vector<24x128xf32>,
    } else {
    }
    %c0 = arith.constant 0 : index
    %c0_1 = arith.constant 0 : index
    %3 = vector.load %arg2[%c0, %c0_1] : memref<24x128xf32, #tpu.memory_space<vmem>>, vector<24x128xf32>
    %c0_2 = arith.constant 0 : index
    %c0_3 = arith.constant 0 : index
    %4 = vector.load %arg8[%c0_2, %c0_3] : memref<24x128xf32, #tpu.memory_space<vmem>>, vector<24x128xf32>
    %5 = tpu.concatenate %3, %4 in 1 : vector<24x128xf32>, vector<24x128xf32> -> vector<24x256xf32>
    %c0_4 = arith.constant 0 : index
    %c0_5 = arith.constant 0 : index
    %6 = vector.load %arg5[%c0_4, %c0_5] : memref<256x128xf32, #tpu.memory_space<vmem>>, vector<256x128xf32>
    %cst = arith.constant dense<0.000000e+00> : vector<24x128xf32>
    %7 = tpu.matmul %5, %6, %cst {dimension_numbers = #tpu.dot_dimension_numbers<[1], [0], [0], [1], [0, 0, 1, 1], [], []>} : vector<24x256xf32>, vector<256x128xf32>, vector<24x128xf32> -> vector<24x128xf32>
    %c0_6 = arith.constant 0 : index
    %c0_7 = arith.constant 0 : index
    %8 = vector.load %arg6[%c0_6, %c0_7] : memref<1x128xf32, #tpu.memory_space<vmem>>, vector<1x128xf32>
    %9 = vector.broadcast %8 : vector<1x128xf32> to vector<24x128xf32>
    %10 = arith.addf %7, %9 : vector<24x128xf32>
    %c0_8 = arith.constant 0 : index
    %c0_9 = arith.constant 0 : index
    %11 = vector.load %arg7[%c0_8, %c0_9] : memref<24x128xf32, #tpu.memory_space<vmem>>, vector<24x128xf32>
    tpu.vector_store %arg7[%c0_8, %c0_9], %10 {strides = array<i32>} : memref<24x128xf32, #tpu.memory_space<vmem>>, vector<24x128xf32>,
    return
  }
  func.func @transform_0(%arg0: i32, %arg1: i32) -> (i32, i32) {
    %c0_i32 = arith.constant 0 : i32
    %c0_i32_0 = arith.constant 0 : i32
    return %arg0, %c0_i32 : i32, i32
  }
  func.func @transform_1(%arg0: i32, %arg1: i32) -> (i32, i32) {
    %c0_i32 = arith.constant 0 : i32
    %c0_i32_0 = arith.constant 0 : i32
    %c0_i32_1 = arith.constant 0 : i32
    return %c0_i32, %c0_i32_0 : i32, i32
  }
  func.func @transform_2(%arg0: i32, %arg1: i32) -> (i32, i32) {
    %c0_i32 = arith.constant 0 : i32
    %c0_i32_0 = arith.constant 0 : i32
    %c0_i32_1 = arith.constant 0 : i32
    return %c0_i32, %c0_i32_0 : i32, i32
  }
  func.func @transform_3(%arg0: i32, %arg1: i32) -> (i32, i32) {
    %c0_i32 = arith.constant 0 : i32
    %c0_i32_0 = arith.constant 0 : i32
    return %c0_i32, %arg1 : i32, i32
  }
  func.func @transform_4(%arg0: i32, %arg1: i32) -> (i32, i32) {
    %c0_i32 = arith.constant 0 : i32
    %c0_i32_0 = arith.constant 0 : i32
    return %c0_i32, %arg1 : i32, i32
  }
  func.func @transform_5(%arg0: i32, %arg1: i32) -> (i32, i32) {
    %c0_i32 = arith.constant 0 : i32
    return %arg0, %arg1 : i32, i32
  }
}

</mosaic_0001>

<bundles_post_ra>
// kernel: tpu_custom_call.1
= control target key start
LH: loop header
LB: loop body
LE: loop exit
PB: predicated region body
PF: predicated region fallthrough
CT: control target
= control target key end

     0   :  { %10 = vsyncpa [#allocation4], 0  ;;  %s614_s0 = inlined_call_operand.hbm [shape: f32[24,128], index: 0, kind: input, shape index: {}]   ;;  %s615_s1 = inlined_call_operand.hbm [shape: f32[128,128], index: 1, kind: input, shape index: {}]   ;;  %s616_s2 = inlined_call_operand.vmem [shape: f32[1,128], index: 2, kind: input, shape index: {}]   ;;  %s617_s3 = inlined_call_operand.hbm [shape: f32[256,128], index: 3, kind: input, shape index: {}]   ;;  %s618_s4 = inlined_call_operand.vmem [shape: f32[1,128], index: 4, kind: input, shape index: {}]   ;;  %s619_s5 = inlined_call_operand.hbm [shape: f32[24,128], index: 5, kind: output, shape index: {}]  }
   0x1   :  { %11 = vsyncpa [#allocation7], 0 }
   0x2   :  { %12 = vsyncpa [#allocation5], 0  ;;  %s524_s18 = smov [#allocation6]   ;;  %s525_s20 = smov [#allocation3]  }
   0x3   :  { %s30_s19 = sshll.u32 %s524_s18, 4  ;;  %s18_s21 = sshll.u32 %s525_s20, 4  ;;  %s31_s19 = int_to_ptr.vmem [resolvable:$true] %s30_s19  ;;  %s19_s21 = int_to_ptr.vmem [resolvable:$true] %s18_s21 }
   0x4   :  { %s446_s22 = scalar_lea.vmem %s31_s19, 2048  ;;  %p451_p1 = scmp.lt.s32.totalorder %s31_s19, %s31_s19 }
   0x5   :  { %p447_p0 = scmp.ne.s32.totalorder %s31_s19, %s446_s22  ;;  %p452_p2 = scmp.lt.s32.totalorder %s446_s22, %s446_s22 }
   0x7   :  { %p453_p3 = por %p452_p2, %p451_p1 }
   0x9   :  { %p454_p4 = pnand %p453_p3, %p447_p0 }
   0xb   :  { %457 = shalt.err (!%p454_p4)
}
   0xc   :  { %s526_s23 = smov 128   ;;  %s527_s24 = smov 8  }
   0xd   :  { %36 = dma.hbm_to_vmem [thread:$0]  %s615_s1, 2048, %s31_s19, [#allocation7], %s526_s23, %s526_s23, %s527_s24  }
   0xe   :  { %s466_s27 = scalar_lea.vmem %s19_s21, 384  ;;  %p471_p6 = scmp.lt.s32.totalorder %s19_s21, %s19_s21 }
   0xf   :  { %p467_p5 = scmp.ne.s32.totalorder %s19_s21, %s466_s27  ;;  %p472_p7 = scmp.lt.s32.totalorder %s466_s27, %s466_s27 }
  0x11   :  { %p473_p8 = por %p472_p7, %p471_p6 }
  0x13   :  { %p474_p9 = pnand %p473_p8, %p467_p5 }
  0x15   :  { %477 = shalt.err (!%p474_p9)
}
  0x16   :  { %24 = dma.hbm_to_vmem [thread:$0]  %s614_s0, 384, %s19_s21, [#allocation4], %s526_s23, %s526_s23, %s527_s24  }
  0x17   :  { %s528_s30 = smov [#allocation8]  }
  0x18   :  { %s44_s6 = sshll.u32 %s528_s30, 4  ;;  %s45_s6 = int_to_ptr.vmem [resolvable:$true] %s44_s6 }
  0x19   :  { %s486_s7 = scalar_lea.vmem %s45_s6, 4096  ;;  %p491_p11 = scmp.lt.s32.totalorder %s45_s6, %s45_s6 }
  0x1a   :  { %p487_p10 = scmp.ne.s32.totalorder %s45_s6, %s486_s7  ;;  %p492_p12 = scmp.lt.s32.totalorder %s486_s7, %s486_s7 }
  0x1c   :  { %p493_p13 = por %p492_p12, %p491_p11 }
  0x1e   :  { %p494_p0 = pnand %p493_p13, %p487_p10 }
  0x20   :  { %497 = shalt.err (!%p494_p0)
}
  0x21   :  { %50 = dma.hbm_to_vmem [thread:$0]  %s617_s3, 4096, %s45_s6, [#allocation7], %s526_s23, %s526_s23, %s527_s24  }
  0x22   :  { %518 = dma.done.wait [#allocation4], 384  }
  0x23   :  { %519 = vsyncadd [#allocation4], 4294966912 }
  0x24   :  { %520 = dma.done.wait [#allocation7], 6144  }
  0x25   :  { %521 = vsyncadd [#allocation7], 4294961152  ;;  %v529_v0 = vmov 0.0   ;;  %vm530_vm0 = vmmov 0   ;;  %v87_v1 = vld [vmem:[#allocation6 + $0x78] sm:$0xff]  ;;  %v86_v2 = vld [vmem:[#allocation6 + $0x70] sm:$0xff] }
  0x26   :  { %389 = vmatprep.subr.mxu0 %v529_v0  ;;  %421 = vmatprep.mubr.msk.f32.mxu0 %vm530_vm0, %v529_v0  ;;  %v85_v3 = vld [vmem:[#allocation6 + $0x68] sm:$0xff]  ;;  %v84_v4 = vld [vmem:[#allocation6 + $0x60] sm:$0xff]  ;;  %v83_v5 = vld [vmem:[#allocation6 + $0x58] sm:$0xff]  ;;  %s531_s10 = smov [#allocation9]  }
  0x27   :  { %390 = vmatpush3.msra.mxu0 %v87_v1  ;;  %v218_v6 = vld [vmem:[#allocation8 + $0xf8] sm:$0xff]  ;;  %v217_v8 = vld [vmem:[#allocation8 + $0xf0] sm:$0xff]  ;;  %v216_v11 = vld [vmem:[#allocation8 + $0xe8] sm:$0xff]  ;;  %s314_s11 = sshll.u32 %s531_s10, 4  ;;  %s315_s11 = int_to_ptr.vmem [resolvable:$true] %s314_s11 }
  0x28   :  { %391 = vmatprep.subr.mxu0 %v529_v0  ;;  %v202_v7 = vld [vmem:[#allocation8 + $0x78] sm:$0xff]  ;;  %348 = vmatprep.subr.mxu1 %v218_v6  ;;  %v201_v9 = vld [vmem:[#allocation8 + $0x70] sm:$0xff]  ;;  %v200_v12 = vld [vmem:[#allocation8 + $0x68] sm:$0xff]  ;;  %s498_s12 = scalar_lea.vmem %s315_s11, 384  ;;  %p503_p2 = scmp.lt.s32.totalorder %s315_s11, %s315_s11 }
  0x29   :  { %392 = vmatpush3.msra.mxu0 %v86_v2  ;;  %v82_v10 = vld [vmem:[#allocation6 + $0x50] sm:$0xff]  ;;  %349 = vmatpush3.msra.mxu1 %v202_v7  ;;  %v81_v13 = vld [vmem:[#allocation6 + $0x48] sm:$0xff]  ;;  %v215_v14 = vld [vmem:[#allocation8 + $0xe0] sm:$0xff]  ;;  %p499_p1 = scmp.ne.s32.totalorder %s315_s11, %s498_s12  ;;  %p504_p3 = scmp.lt.s32.totalorder %s498_s12, %s498_s12 }
  0x2a   :  { %393 = vmatprep.subr.mxu0 %v529_v0  ;;  %350 = vmatprep.subr.mxu1 %v217_v8  ;;  %v199_v15 = vld [vmem:[#allocation8 + $0x60] sm:$0xff]  ;;  %v214_v17 = vld [vmem:[#allocation8 + $0xd8] sm:$0xff]  ;;  %v213_v20 = vld [vmem:[#allocation8 + $0xd0] sm:$0xff] }
  0x2b   :  { %394 = vmatpush3.msra.mxu0 %v85_v3  ;;  %351 = vmatpush3.msra.mxu1 %v201_v9  ;;  %v80_v16 = vld [vmem:[#allocation6 + $0x40] sm:$0xff]  ;;  %v198_v18 = vld [vmem:[#allocation8 + $0x58] sm:$0xff]  ;;  %v197_v21 = vld [vmem:[#allocation8 + $0x50] sm:$0xff]  ;;  %p505_p4 = por %p504_p3, %p503_p2 }
  0x2c   :  { %395 = vmatprep.subr.mxu0 %v529_v0  ;;  %352 = vmatprep.subr.mxu1 %v216_v11  ;;  %v79_v19 = vld [vmem:[#allocation6 + $0x38] sm:$0xff]  ;;  %v78_v22 = vld [vmem:[#allocation6 + $0x30] sm:$0xff]  ;;  %v212_v23 = vld [vmem:[#allocation8 + $0xc8] sm:$0xff] }
  0x2d   :  { %396 = vmatpush3.msra.mxu0 %v84_v4  ;;  %353 = vmatpush3.msra.mxu1 %v200_v12  ;;  %v196_v24 = vld [vmem:[#allocation8 + $0x48] sm:$0xff]  ;;  %v211_v26 = vld [vmem:[#allocation8 + $0xc0] sm:$0xff]  ;;  %v210_v29 = vld [vmem:[#allocation8 + $0xb8] sm:$0xff]  ;;  %p506_p5 = pnand %p505_p4, %p499_p1 }
  0x2e   :  { %397 = vmatprep.subr.mxu0 %v529_v0  ;;  %354 = vmatprep.subr.mxu1 %v215_v14  ;;  %v77_v25 = vld [vmem:[#allocation6 + $0x28] sm:$0xff]  ;;  %v195_v27 = vld [vmem:[#allocation8 + $0x40] sm:$0xff]  ;;  %v194_v30 = vld [vmem:[#allocation8 + $0x38] sm:$0xff] }
  0x2f   :  { %398 = vmatpush3.msra.mxu0 %v83_v5  ;;  %355 = vmatpush3.msra.mxu1 %v199_v15  ;;  %v76_v28 = vld [vmem:[#allocation6 + $0x20] sm:$0xff]  ;;  %v75_v31 = vld [vmem:[#allocation6 + $0x18] sm:$0xff]  ;;  %v209_v32 = vld [vmem:[#allocation8 + $0xb0] sm:$0xff] }
  0x30   :  { %399 = vmatprep.subr.mxu0 %v529_v0  ;;  %356 = vmatprep.subr.mxu1 %v214_v17  ;;  %v193_v33 = vld [vmem:[#allocation8 + $0x30] sm:$0xff]  ;;  %v208_v35 = vld [vmem:[#allocation8 + $0xa8] sm:$0xff]  ;;  %v207_v39 = vld [vmem:[#allocation8 + $0xa0] sm:$0xff] }
  0x31   :  { %400 = vmatpush3.msra.mxu0 %v82_v10  ;;  %357 = vmatpush3.msra.mxu1 %v198_v18  ;;  %v74_v34 = vld [vmem:[#allocation6 + $0x10] sm:$0xff]  ;;  %v66_v36 = vld [vmem:[#allocation3] sm:$0xff]  ;;  %v191_v40 = vld [vmem:[#allocation8 + $0x20] sm:$0xff] }
  0x32   :  { %401 = vmatprep.subr.mxu0 %v529_v0  ;;  %358 = vmatprep.subr.mxu1 %v213_v20  ;;  %v192_v37 = vld [vmem:[#allocation8 + $0x28] sm:$0xff]  ;;  %v72_v41 = vld [vmem:[#allocation6] sm:$0xff]  ;;  %v69_v42 = vmax.f32 %v66_v36, 0.0  ;;  %v206_v43 = vld [vmem:[#allocation8 + $0x98] sm:$0xff] }
  0x33   :  { %402 = vmatpush3.msra.mxu0 %v81_v13  ;;  %359 = vmatpush3.msra.mxu1 %v197_v21  ;;  %v73_v38 = vld [vmem:[#allocation6 + $0x8] sm:$0xff]  ;;  %v67_v44 = vld [vmem:[#allocation3 + $0x8] sm:$0xff]  ;;  %v190_v45 = vld [vmem:[#allocation8 + $0x18] sm:$0xff] }
  0x34   :  { %403 = vmatprep.subr.mxu0 %v529_v0  ;;  %360 = vmatprep.subr.mxu1 %v212_v23  ;;  %v70_v46 = vmax.f32 %v67_v44, 0.0  ;;  %v68_v47 = vld [vmem:[#allocation3 + $0x10] sm:$0xff]  ;;  %v205_v49 = vld [vmem:[#allocation8 + $0x90] sm:$0xff]  ;;  %v204_v51 = vld [vmem:[#allocation8 + $0x88] sm:$0xff] }
  0x35   :  { %404 = vmatpush3.msra.mxu0 %v80_v16  ;;  %361 = vmatpush3.msra.mxu1 %v196_v24  ;;  %v71_v48 = vmax.f32 %v68_v47, 0.0  ;;  %v189_v50 = vld [vmem:[#allocation8 + $0x10] sm:$0xff]  ;;  %v188_v52 = vld [vmem:[#allocation8 + $0x8] sm:$0xff]  ;;  %v203_v53 = vld [vmem:[#allocation8 + $0x80] sm:$0xff] }
  0x36   :  { %405 = vmatprep.subr.mxu0 %v529_v0  ;;  %362 = vmatprep.subr.mxu1 %v211_v26  ;;  %v187_v54 = vld [vmem:[#allocation8] sm:$0xff]  ;;  %v327_v55 = vld [vmem:[%s616_s2] ss:$0 sm:$0xff] }
  0x37   :  { %406 = vmatpush3.msra.mxu0 %v79_v19  ;;  %363 = vmatpush3.msra.mxu1 %v195_v27  ;;  %v328_v5 = vld [vmem:[%s618_s4] ss:$0 sm:$0xff] }
  0x38   :  { %407 = vmatprep.subr.mxu0 %v529_v0  ;;  %364 = vmatprep.subr.mxu1 %v210_v29 }
  0x39   :  { %408 = vmatpush3.msra.mxu0 %v78_v22  ;;  %365 = vmatpush3.msra.mxu1 %v194_v30 }
  0x3a   :  { %409 = vmatprep.subr.mxu0 %v529_v0  ;;  %366 = vmatprep.subr.mxu1 %v209_v32 }
  0x3b   :  { %410 = vmatpush3.msra.mxu0 %v77_v25  ;;  %367 = vmatpush3.msra.mxu1 %v193_v33 }
  0x3c   :  { %411 = vmatprep.subr.mxu0 %v529_v0  ;;  %368 = vmatprep.subr.mxu1 %v208_v35 }
  0x3d   :  { %412 = vmatpush3.msra.mxu0 %v76_v28  ;;  %369 = vmatpush3.msra.mxu1 %v192_v37 }
  0x3e   :  { %413 = vmatprep.subr.mxu0 %v529_v0  ;;  %370 = vmatprep.subr.mxu1 %v207_v39 }
  0x3f   :  { %414 = vmatpush3.msra.mxu0 %v75_v31  ;;  %371 = vmatpush3.msra.mxu1 %v191_v40 }
  0x40   :  { %415 = vmatprep.subr.mxu0 %v529_v0  ;;  %372 = vmatprep.subr.mxu1 %v206_v43 }
  0x41   :  { %416 = vmatpush3.msra.mxu0 %v74_v34  ;;  %373 = vmatpush3.msra.mxu1 %v190_v45 }
  0x42   :  { %417 = vmatprep.subr.mxu0 %v529_v0  ;;  %374 = vmatprep.subr.mxu1 %v205_v49 }
  0x43   :  { %418 = vmatpush3.msra.mxu0 %v73_v38  ;;  %375 = vmatpush3.msra.mxu1 %v189_v50 }
  0x44   :  { %419 = vmatprep.subr.mxu0 %v529_v0  ;;  %376 = vmatprep.subr.mxu1 %v204_v51 }
  0x45   :  { %420 = vmatpush3.msra.mxu0 %v72_v41  ;;  %377 = vmatpush3.msra.mxu1 %v188_v52 }
  0x46   :  { %422 = vmatmul.mubr.f32.vlgmr.msra.gmra.mxu0 %v69_v42  ;;  %378 = vmatprep.subr.mxu1 %v203_v53 }
  0x47   :  { %424 = vmatprep.mubr.msk.f32.mxu0 %vm530_vm0, %v529_v0  ;;  %379 = vmatpush3.msra.mxu1 %v187_v54 }
  0x4a   :  { %425 = vmatmul.mubr.f32.gmra.mxu0 %v70_v46 }
  0x4b   :  { %427 = vmatprep.mubr.msk.f32.mxu0 %vm530_vm0, %v529_v0 }
  0x4e   :  { %428 = vmatmul.mubr.f32.gmra.mxu0 %v71_v48 }
 0x106   :  { %v161_v56 = vpop.f32.mrf.mxu0 }
 0x107   :  { %v162_v57 = vadd.f32 %v327_v55, %v161_v56 }
 0x108   :  { %v423_v58 = vpop.f32.mrf.mxu0 }
 0x109   :  { %v175_v59 = vmax.f32 %v162_v57, 0.0 }
 0x10a   :  { %v166_v60 = vpop.f32.mrf.mxu0 }
 0x10b   :  { %v167_v61 = vadd.f32 %v327_v55, %v166_v60  ;;  %290 = vmatprep.mubr.f32.mxu1 %v175_v59 }
 0x10c   :  { %v426_v62 = vpop.f32.mrf.mxu0  ;;  %291 = vmatmul.mubr.f32.vlgmr.msra.gmra.mxu1 %v66_v36 }
 0x10d   :  { %v176_v63 = vmax.f32 %v167_v61, 0.0 }
 0x10e   :  { %v171_v0 = vpop.f32.mrf.mxu0 }
 0x10f   :  { %v172_v1 = vadd.f32 %v327_v55, %v171_v0  ;;  %295 = vmatprep.mubr.f32.mxu1 %v176_v63 }
 0x110   :  { %v429_v2 = vpop.f32.mrf.mxu0  ;;  %296 = vmatmul.mubr.f32.gmra.mxu1 %v67_v44 }
 0x111   :  { %v177_v3 = vmax.f32 %v172_v1, 0.0 }
 0x113   :  { %300 = vmatprep.mubr.f32.mxu1 %v177_v3 }
 0x114   :  { %301 = vmatmul.mubr.f32.gmra.mxu1 %v68_v47 }
 0x1cc   :  { %v380_v4 = vpop.f32.mrf.mxu1 }
 0x1ce   :  { %v381_v6 = vpop.f32.mrf.mxu1 }
 0x1cf   :  { %v382_v7 = vadd.f32 %v381_v6, %v380_v4 }
 0x1d0   :  { %v383_v8 = vpop.f32.mrf.mxu1 }
 0x1d1   :  { %v293_v9 = vadd.f32 %v382_v7, %v328_v5 }
 0x1d2   :  { %v384_v10 = vpop.f32.mrf.mxu1 }
 0x1d3   :  { %306 = vst [vmem:[#allocation9] sm:$0xff] %v293_v9  ;;  %v385_v11 = vadd.f32 %v384_v10, %v383_v8 }
 0x1d4   :  { %v386_v12 = vpop.f32.mrf.mxu1 }
 0x1d5   :  { %v298_v13 = vadd.f32 %v385_v11, %v328_v5 }
 0x1d6   :  { %v387_v14 = vpop.f32.mrf.mxu1 }
 0x1d7   :  { %307 = vst [vmem:[#allocation9 + $0x8] sm:$0xff] %v298_v13  ;;  %v388_v15 = vadd.f32 %v387_v14, %v386_v12 }
 0x1d9   :  { %v303_v16 = vadd.f32 %v388_v15, %v328_v5 }
 0x1db   :  { %308 = vst [vmem:[#allocation9 + $0x10] sm:$0xff] %v303_v16 }
 0x1dc   :  { %509 = shalt.err (!%p506_p5)
}
 0x1dd   :  { %320 = dma.vmem_to_hbm [thread:$0]  %s315_s11, 384, %s619_s5, [#allocation5], %s526_s23, %s526_s23, %s527_s24  }
 0x1de   :  { %522 = dma.done.wait [#allocation5], 384  }
 0x1df   :  { %523 = vsyncadd [#allocation5], 4294966912 }
 0x1e0   :  { %324 = vsyncpa [#allocation4], 1 }
 0x1e1   :  { %325 = vsyncpa [#allocation7], 1 }
 0x1e2   :  { %326 = vsyncpa [#allocation5], 1 }

</bundles_post_ra>
